<compile_context>
chip_gen: v5e
topology: v5e:2x2
jax: 0.10.0
libtpu: 0.0.40
codegen_flags: <defaults>
</compile_context>

<pallas_src>
import math

import numpy as np
import jax
import jax.numpy as jnp
from jax.experimental import pallas as pl
from jax.experimental.pallas import tpu as pltpu

# ----- small, forward-consistent shapes -----
B, C, H, W = 2, 3, 16, 16      # image batch, NCHW
S = 8                          # text sequence length
VIS_OUT = 64                   # resnet trunk feature dim (vis_out)
E = 32                         # input_len == embed_dim == GAT hidden_size
HID = 16                       # mlp hidden_size
NUM_LABELS = 4
VOCAB = 100

LANE = 128                     # lane width of the packed buffers
_INV_SQRT_E = 1.0 / math.sqrt(E)

# ----- dense packed parameter layout: name -> (row, lane, n_rows, n_lanes) -----
# Weights stored transposed (fan_in, fan_out); biases as (1, fan_out).  Narrow tensors
# share rows by living in disjoint lane ranges; wq|wk|wv and bq|bk|bv are adjacent so the
# kernel reads them back as one fused (E,3E) weight / (1,3E) bias.
PARAM_SLOTS = {
    "wfc": (0,    0, VIS_OUT, E),          # vm.fc
    "wm1": (0,   32, 2 * E, 2 * E),        # merge Linear(2E,2E)
    "wm2": (0,   96, 2 * E, E),            # merge Linear(2E,E)
    "wq":  (64,   0, E, E),                # gat.query_linear
    "wk":  (64,  32, E, E),                # gat.key_linear
    "wv":  (64,  64, E, E),                # gat.value_linear
    "w3":  (64,  96, E, HID),              # mlp Linear(E,HID)
    "w4":  (64, 112, HID, HID),            # mlp Linear(HID,HID)
    "w5":  (80, 112, HID, NUM_LABELS),     # mlp Linear(HID,num_labels)
    "bfc": (96,   0, 1, E),
    "bq":  (96,  32, 1, E),
    "bk":  (96,  64, 1, E),
    "bv":  (96,  96, 1, E),
    "bm1": (97,   0, 1, 2 * E),
    "bm2": (97,  64, 1, E),
    "b3":  (97,  96, 1, HID),
    "b4":  (97, 112, 1, HID),
    "b5":  (98,   0, 1, NUM_LABELS),
}
PARAM_ROWS = 104               # 52 KB f32 slab vs ~48.3 KB of raw parameter bytes
# TODO(synk): on v6e/v7x the slab could be stored bf16 (cast activations at the dot inputs,
# keep f32 accumulation) for another ~2x cut of the dominant parameter DMA; kept f32 here
# for PyTorch numerical parity and v5e friendliness.

_LAYERS = [
    ("wfc", "bfc", VIS_OUT, E),
    ("wq",  "bq",  E, E),
    ("wk",  "bk",  E, E),
    ("wv",  "bv",  E, E),
    ("wm1", "bm1", 2 * E, 2 * E),
    ("wm2", "bm2", 2 * E, E),
    ("w3",  "b3",  E, HID),
    ("w4",  "b4",  HID, HID),
    ("w5",  "b5",  HID, NUM_LABELS),
]


def fused_forward_kernel(img_ref, txt_ref, params_ref, out_ref):
    f32 = jnp.float32

    def P(name):
        r, c, nr, nc = PARAM_SLOTS[name]
        return params_ref[r:r + nr, c:c + nc]

    img = img_ref[...]                                   # (B, VIS_OUT) pooled trunk features
    x2 = txt_ref[...]                                    # (B*S, E) roberta hidden states

    # --- self.vm.fc : Linear(vis_out, input_len) ---
    image = jnp.dot(img, P("wfc"), preferred_element_type=f32) + P("bfc")            # (B, E)

    # --- GraphAttentionLayer(text); only attention row 0 per batch is consumed downstream ---
    qr, qc, _, _ = PARAM_SLOTS["wq"]
    wqkv = params_ref[qr:qr + E, qc:qc + 3 * E]          # [wq|wk|wv]  (E, 3E)
    br, bc, _, _ = PARAM_SLOTS["bq"]
    bqkv = params_ref[br:br + 1, bc:bc + 3 * E]          # [bq|bk|bv]  (1, 3E)
    qkv = jnp.dot(x2, wqkv, preferred_element_type=f32) + bqkv                        # (B*S, 3E)
    k = qkv[:, E:2 * E]                                  # (B*S, E)
    v = qkv[:, 2 * E:3 * E]                              # (B*S, E)
    q0 = jnp.concatenate([qkv[b * S:b * S + 1, :E] for b in range(B)], axis=0)        # (B, E)

    # scores on the MXU: q0 @ k.T over all B*S keys; mask cross-batch entries before softmax.
    scores = jnp.dot(q0, k.T, preferred_element_type=f32) * _INV_SQRT_E               # (B, B*S)
    row_b = jax.lax.broadcasted_iota(jnp.int32, (B, B * S), 0)
    col_i = jax.lax.broadcasted_iota(jnp.int32, (B, B * S), 1)
    in_batch = (col_i >= row_b * S) & (col_i < (row_b + 1) * S)
    scores = jnp.where(in_batch, scores, jnp.float32(-1e30))
    # TODO(synk): nn.Dropout(0.2) on attention_scores is identity in eval mode; train-mode RNG not implemented.
    mx = jnp.max(scores, axis=-1, keepdims=True)
    p = jnp.exp(scores - mx)
    weights = p * pl.reciprocal(jnp.sum(p, axis=-1, keepdims=True), approx=True)      # softmax(dim=-1)
    text_gat = jnp.dot(weights, v, preferred_element_type=f32)                        # (B, E)

    # --- merge: ReLU -> Linear(2E,2E) -> ReLU -> Linear(2E,E) ---
    # wm1 split into two K=E halves: h1 = relu(relu(image)@wm1[:E] + relu(gat)@wm1[E:] + bm1)
    mr, mc, _, _ = PARAM_SLOTS["wm1"]
    wm1a = params_ref[mr:mr + E, mc:mc + 2 * E]
    wm1b = params_ref[mr + E:mr + 2 * E, mc:mc + 2 * E]
    h1 = jnp.maximum(
        jnp.dot(jnp.maximum(image, 0.0), wm1a, preferred_element_type=f32)
        + jnp.dot(jnp.maximum(text_gat, 0.0), wm1b, preferred_element_type=f32)
        + P("bm1"), 0.0)                                                               # (B, 2E)
    merged = jnp.dot(h1, P("wm2"), preferred_element_type=f32) + P("bm2")              # (B, E)

    # --- mlp head: Linear(E,H) -> ReLU -> Linear(H,H) -> ReLU -> Linear(H,num_labels) ---
    h = jnp.maximum(jnp.dot(merged, P("w3"), preferred_element_type=f32) + P("b3"), 0.0)
    h = jnp.maximum(jnp.dot(h, P("w4"), preferred_element_type=f32) + P("b4"), 0.0)
    label = jnp.dot(h, P("w5"), preferred_element_type=f32) + P("b5")                  # (B, NUM_LABELS)

    # --- direct lane sub-stores into the single (B,128) output tile (split in wrapper) ---
    out_ref[...] = jnp.zeros((B, LANE), f32)
    out_ref[:, 0:NUM_LABELS] = label
    out_ref[:, NUM_LABELS:NUM_LABELS + E] = merged
    out_ref[:, NUM_LABELS + E:NUM_LABELS + 2 * E] = image
    out_ref[:, NUM_LABELS + 2 * E:NUM_LABELS + 3 * E] = text_gat


def pack_params(params):
    """One-time dense packing of all 18 parameter tensors into a (104,128) f32 slab."""
    buf = jnp.zeros((PARAM_ROWS, LANE), jnp.float32)
    for name, (r, c, nr, nc) in PARAM_SLOTS.items():
        buf = buf.at[r:r + nr, c:c + nc].set(jnp.asarray(params[name], jnp.float32).reshape(nr, nc))
    return buf


def forward(img_feat, text_hidden, packed_params):
    """Runs the fused Pallas kernel. Returns (label_output, merged, image, text_gat)."""
    vmem = pl.BlockSpec(memory_space=pltpu.MemorySpace.VMEM)
    out = pl.pallas_call(
        fused_forward_kernel,
        out_shape=jax.ShapeDtypeStruct((B, LANE), jnp.float32),
        in_specs=[vmem, vmem, vmem],
        out_specs=vmem,
    )(img_feat.astype(jnp.float32),
      text_hidden.reshape(B * S, E).astype(jnp.float32),
      packed_params)
    label_output = out[:, :NUM_LABELS]
    merged = out[:, NUM_LABELS:NUM_LABELS + E]
    image = out[:, NUM_LABELS + E:NUM_LABELS + 2 * E]
    text_gat = out[:, NUM_LABELS + 2 * E:NUM_LABELS + 3 * E]
    return label_output, merged, image, text_gat


def make_linear_params(kw, kb, fan_in, fan_out):
    """PyTorch nn.Linear-style uniform init; weight stored transposed (in, out)."""
    s = 1.0 / math.sqrt(fan_in)
    w = jax.random.uniform(kw, (fan_in, fan_out), jnp.float32, -s, s)
    b = jax.random.uniform(kb, (1, fan_out), jnp.float32, -s, s)
    return w, b


def reference_forward(img_feat, text_hidden, params):
    """Pure-JAX reference of the fused path (exact softmax) for a tolerance check."""
    image = img_feat @ params["wfc"] + params["bfc"]                       # (B, E)
    x = text_hidden                                                        # (B, S, E)
    q = x @ params["wq"] + params["bq"]
    k = x @ params["wk"] + params["bk"]
    v = x @ params["wv"] + params["bv"]
    scores = jnp.einsum("bqe,bke->bqk", q, k) / math.sqrt(E)
    w = jax.nn.softmax(scores, axis=-1)
    text_gat = jnp.einsum("bqk,bke->bqe", w, v)[:, 0, :]                   # (B, E)
    cat = jnp.maximum(jnp.concatenate([image, text_gat], axis=1), 0.0)
    h1 = jnp.maximum(cat @ params["wm1"] + params["bm1"], 0.0)
    merged = h1 @ params["wm2"] + params["bm2"]
    h = jnp.maximum(merged @ params["w3"] + params["b3"], 0.0)
    h = jnp.maximum(h @ params["w4"] + params["b4"], 0.0)
    label = h @ params["w5"] + params["b5"]
    return label, merged, image, text_gat


if __name__ == "__main__":
    key = jax.random.PRNGKey(0)
    keys = jax.random.split(key, 8)

    # Raw module inputs (deterministic).
    image_in = jax.random.normal(keys[0], (B, C, H, W), jnp.float32)       # NCHW image
    text_ids = jax.random.randint(keys[1], (B, S), 0, VOCAB)               # token ids
    label_in = jax.random.randint(keys[2], (B,), 0, NUM_LABELS)            # unused by forward compute

    # TODO(synk): torchvision resnet50 pretrained trunk has no in-script Pallas equivalent;
    # replaced by deterministic global-average-pool + linear projection to VIS_OUT.
    trunk_w = jax.random.normal(keys[3], (C, VIS_OUT), jnp.float32) * 0.1
    img_feat = jnp.mean(image_in, axis=(2, 3)) @ trunk_w                   # (B, VIS_OUT)

    # TODO(synk): RobertaModel.from_pretrained('roberta-base') has no in-script Pallas
    # equivalent; replaced by a deterministic embedding table producing last_hidden_state.
    embed_tbl = jax.random.normal(keys[4], (VOCAB, E), jnp.float32) * 0.1
    text_hidden = embed_tbl[text_ids]                                      # (B, S, E)

    # Module-owned parameters (vm.fc, GAT q/k/v, merge, mlp head).  image_space /
    # text_space are defined in __init__ but unused in forward, so omitted.
    pkeys = jax.random.split(keys[5], 2 * len(_LAYERS))
    params = {}
    for i, (wn, bn, fi, fo) in enumerate(_LAYERS):
        w, b = make_linear_params(pkeys[2 * i], pkeys[2 * i + 1], fi, fo)
        params[wn] = w
        params[bn] = b
    packed_params = pack_params(params)

    outs = forward(img_feat, text_hidden, packed_params)
    jax.block_until_ready(outs)
    label_output, merged, image_feat_out, text_gat = outs

    assert label_output.shape == (B, NUM_LABELS)
    assert merged.shape == (B, E)
    assert image_feat_out.shape == (B, E)
    assert text_gat.shape == (B, E)

    # Correctness vs pure-JAX reference (loose tolerance: pl.reciprocal(approx=True) in softmax).
    refs = reference_forward(img_feat, text_hidden, params)
    for got, want in zip(outs, refs):
        np.testing.assert_allclose(np.asarray(got), np.asarray(want), rtol=2e-2, atol=2e-3)

    print("KERNEL_OK")
</pallas_src>

<mosaic_0001>
module attributes {stable_mosaic.version = 11 : i64} {
  func.func @fused_forward_kernel(%arg0: memref<2x64xf32, #tpu.memory_space<vmem>>, %arg1: memref<16x32xf32, #tpu.memory_space<vmem>>, %arg2: memref<104x128xf32, #tpu.memory_space<vmem>>, %arg3: memref<2x128xf32, #tpu.memory_space<vmem>>) attributes {dimension_semantics = [], scalar_prefetch = 0 : i64, scratch_operands = 0 : i64, tpu.core_type = #tpu.core_type<tc>} {
    %c0 = arith.constant 0 : index
    %c0_0 = arith.constant 0 : index
    %0 = vector.load %arg0[%c0, %c0_0] : memref<2x64xf32, #tpu.memory_space<vmem>>, vector<2x64xf32>
    %c0_1 = arith.constant 0 : index
    %c0_2 = arith.constant 0 : index
    %1 = vector.load %arg1[%c0_1, %c0_2] : memref<16x32xf32, #tpu.memory_space<vmem>>, vector<16x32xf32>
    %c0_3 = arith.constant 0 : index
    %c0_4 = arith.constant 0 : index
    %2 = vector.load %arg2[%c0_3, %c0_4] : memref<104x128xf32, #tpu.memory_space<vmem>>, vector<64x32xf32>
    %cst = arith.constant dense<0.000000e+00> : vector<2x32xf32>
    %3 = tpu.matmul %0, %2, %cst {dimension_numbers = #tpu.dot_dimension_numbers<[1], [0], [0], [1], [0, 0, 1, 1], [], []>} : vector<2x64xf32>, vector<64x32xf32>, vector<2x32xf32> -> vector<2x32xf32>
    %c96 = arith.constant 96 : index
    %c0_5 = arith.constant 0 : index
    %4 = vector.load %arg2[%c96, %c0_5] : memref<104x128xf32, #tpu.memory_space<vmem>>, vector<1x32xf32>
    %5 = vector.broadcast %4 : vector<1x32xf32> to vector<2x32xf32>
    %6 = arith.addf %3, %5 : vector<2x32xf32>
    %c64 = arith.constant 64 : index
    %c0_6 = arith.constant 0 : index
    %7 = vector.load %arg2[%c64, %c0_6] : memref<104x128xf32, #tpu.memory_space<vmem>>, vector<32x96xf32>
    %c96_7 = arith.constant 96 : index
    %c32 = arith.constant 32 : index
    %8 = vector.load %arg2[%c96_7, %c32] : memref<104x128xf32, #tpu.memory_space<vmem>>, vector<1x96xf32>
    %cst_8 = arith.constant dense<0.000000e+00> : vector<16x96xf32>
    %9 = tpu.matmul %1, %7, %cst_8 {dimension_numbers = #tpu.dot_dimension_numbers<[1], [0], [0], [1], [0, 0, 1, 1], [], []>} : vector<16x32xf32>, vector<32x96xf32>, vector<16x96xf32> -> vector<16x96xf32>
    %10 = vector.broadcast %8 : vector<1x96xf32> to vector<16x96xf32>
    %11 = arith.addf %9, %10 : vector<16x96xf32>
    %12 = vector.extract_strided_slice %11 {offsets = [0, 32], sizes = [16, 32], strides = [1, 1]} : vector<16x96xf32> to vector<16x32xf32>
    %13 = vector.extract_strided_slice %11 {offsets = [0, 64], sizes = [16, 32], strides = [1, 1]} : vector<16x96xf32> to vector<16x32xf32>
    %14 = vector.extract_strided_slice %11 {offsets = [0, 0], sizes = [1, 32], strides = [1, 1]} : vector<16x96xf32> to vector<1x32xf32>
    %15 = vector.extract_strided_slice %11 {offsets = [8, 0], sizes = [1, 32], strides = [1, 1]} : vector<16x96xf32> to vector<1x32xf32>
    %16 = tpu.concatenate %14, %15 in 0 : vector<1x32xf32>, vector<1x32xf32> -> vector<2x32xf32>
    %17 = tpu.transpose %12, [1, 0] : vector<16x32xf32> -> vector<32x16xf32>
    %cst_9 = arith.constant dense<0.000000e+00> : vector<2x16xf32>
    %18 = tpu.matmul %16, %17, %cst_9 {dimension_numbers = #tpu.dot_dimension_numbers<[1], [0], [0], [1], [0, 0, 1, 1], [], []>} : vector<2x32xf32>, vector<32x16xf32>, vector<2x16xf32> -> vector<2x16xf32>
    %cst_10 = arith.constant 0.176776692 : f32
    %19 = vector.broadcast %cst_10 : f32 to vector<2x16xf32>
    %20 = arith.mulf %18, %19 : vector<2x16xf32>
    %21 = tpu.iota {dimensions = array<i32: 0>} : vector<2x16xi32>
    %22 = tpu.iota {dimensions = array<i32: 1>} : vector<2x16xi32>
    %c8_i32 = arith.constant 8 : i32
    %23 = vector.broadcast %c8_i32 : i32 to vector<2x16xi32>
    %24 = arith.muli %21, %23 : vector<2x16xi32>
    %25 = arith.cmpi sge, %22, %24 : vector<2x16xi32>
    %c1_i32 = arith.constant 1 : i32
    %26 = vector.broadcast %c1_i32 : i32 to vector<2x16xi32>
    %27 = arith.addi %21, %26 : vector<2x16xi32>
    %c8_i32_11 = arith.constant 8 : i32
    %28 = vector.broadcast %c8_i32_11 : i32 to vector<2x16xi32>
    %29 = arith.muli %27, %28 : vector<2x16xi32>
    %30 = arith.cmpi slt, %22, %29 : vector<2x16xi32>
    %31 = arith.andi %25, %30 : vector<2x16xi1>
    %cst_12 = arith.constant -1.000000e+30 : f32
    %32 = vector.broadcast %cst_12 : f32 to vector<2x16xf32>
    %33 = arith.select %31, %20, %32 : vector<2x16xi1>, vector<2x16xf32>
    %cst_13 = arith.constant dense<0xFF800000> : vector<2xf32>
    %34 = vector.multi_reduction <maximumf>, %33, %cst_13 [1] : vector<2x16xf32> to vector<2xf32>
    %35 = vector.shape_cast %34 : vector<2xf32> to vector<2x1xf32>
    %36 = vector.broadcast %35 : vector<2x1xf32> to vector<2x16xf32>
    %37 = arith.subf %33, %36 : vector<2x16xf32>
    %38 = math.exp %37 : vector<2x16xf32>
    %cst_14 = arith.constant dense<0.000000e+00> : vector<2xf32>
    %39 = vector.multi_reduction <add>, %38, %cst_14 [1] : vector<2x16xf32> to vector<2xf32>
    %40 = vector.shape_cast %39 : vector<2xf32> to vector<2x1xf32>
    %41 = tpu.reciprocal %40 {approx = true} : vector<2x1xf32> -> vector<2x1xf32>
    %42 = vector.broadcast %41 : vector<2x1xf32> to vector<2x16xf32>
    %43 = arith.mulf %38, %42 : vector<2x16xf32>
    %cst_15 = arith.constant dense<0.000000e+00> : vector<2x32xf32>
    %44 = tpu.matmul %43, %13, %cst_15 {dimension_numbers = #tpu.dot_dimension_numbers<[1], [0], [0], [1], [0, 0, 1, 1], [], []>} : vector<2x16xf32>, vector<16x32xf32>, vector<2x32xf32> -> vector<2x32xf32>
    %c0_16 = arith.constant 0 : index
    %c32_17 = arith.constant 32 : index
    %45 = vector.load %arg2[%c0_16, %c32_17] : memref<104x128xf32, #tpu.memory_space<vmem>>, vector<32x64xf32>
    %c32_18 = arith.constant 32 : index
    %c32_19 = arith.constant 32 : index
    %46 = vector.load %arg2[%c32_18, %c32_19] : memref<104x128xf32, #tpu.memory_space<vmem>>, vector<32x64xf32>
    %cst_20 = arith.constant 0.000000e+00 : f32
    %47 = vector.broadcast %cst_20 : f32 to vector<2x32xf32>
    %48 = arith.maximumf %6, %47 : vector<2x32xf32>
    %cst_21 = arith.constant dense<0.000000e+00> : vector<2x64xf32>
    %49 = tpu.matmul %48, %45, %cst_21 {dimension_numbers = #tpu.dot_dimension_numbers<[1], [0], [0], [1], [0, 0, 1, 1], [], []>} : vector<2x32xf32>, vector<32x64xf32>, vector<2x64xf32> -> vector<2x64xf32>
    %cst_22 = arith.constant 0.000000e+00 : f32
    %50 = vector.broadcast %cst_22 : f32 to vector<2x32xf32>
    %51 = arith.maximumf %44, %50 : vector<2x32xf32>
    %cst_23 = arith.constant dense<0.000000e+00> : vector<2x64xf32>
    %52 = tpu.matmul %51, %46, %cst_23 {dimension_numbers = #tpu.dot_dimension_numbers<[1], [0], [0], [1], [0, 0, 1, 1], [], []>} : vector<2x32xf32>, vector<32x64xf32>, vector<2x64xf32> -> vector<2x64xf32>
    %53 = arith.addf %49, %52 : vector<2x64xf32>
    %c97 = arith.constant 97 : index
    %c0_24 = arith.constant 0 : index
    %54 = vector.load %arg2[%c97, %c0_24] : memref<104x128xf32, #tpu.memory_space<vmem>>, vector<1x64xf32>
    %55 = vector.broadcast %54 : vector<1x64xf32> to vector<2x64xf32>
    %56 = arith.addf %53, %55 : vector<2x64xf32>
    %cst_25 = arith.constant 0.000000e+00 : f32
    %57 = vector.broadcast %cst_25 : f32 to vector<2x64xf32>
    %58 = arith.maximumf %56, %57 : vector<2x64xf32>
    %c0_26 = arith.constant 0 : index
    %c96_27 = arith.constant 96 : index
    %59 = vector.load %arg2[%c0_26, %c96_27] : memref<104x128xf32, #tpu.memory_space<vmem>>, vector<64x32xf32>
    %cst_28 = arith.constant dense<0.000000e+00> : vector<2x32xf32>
    %60 = tpu.matmul %58, %59, %cst_28 {dimension_numbers = #tpu.dot_dimension_numbers<[1], [0], [0], [1], [0, 0, 1, 1], [], []>} : vector<2x64xf32>, vector<64x32xf32>, vector<2x32xf32> -> vector<2x32xf32>
    %c97_29 = arith.constant 97 : index
    %c64_30 = arith.constant 64 : index
    %61 = vector.load %arg2[%c97_29, %c64_30] : memref<104x128xf32, #tpu.memory_space<vmem>>, vector<1x32xf32>
    %62 = vector.broadcast %61 : vector<1x32xf32> to vector<2x32xf32>
    %63 = arith.addf %60, %62 : vector<2x32xf32>
    %c64_31 = arith.constant 64 : index
    %c96_32 = arith.constant 96 : index
    %64 = vector.load %arg2[%c64_31, %c96_32] : memref<104x128xf32, #tpu.memory_space<vmem>>, vector<32x16xf32>
    %cst_33 = arith.constant dense<0.000000e+00> : vector<2x16xf32>
    %65 = tpu.matmul %63, %64, %cst_33 {dimension_numbers = #tpu.dot_dimension_numbers<[1], [0], [0], [1], [0, 0, 1, 1], [], []>} : vector<2x32xf32>, vector<32x16xf32>, vector<2x16xf32> -> vector<2x16xf32>
    %c97_34 = arith.constant 97 : index
    %c96_35 = arith.constant 96 : index
    %66 = vector.load %arg2[%c97_34, %c96_35] : memref<104x128xf32, #tpu.memory_space<vmem>>, vector<1x16xf32>
    %67 = vector.broadcast %66 : vector<1x16xf32> to vector<2x16xf32>
    %68 = arith.addf %65, %67 : vector<2x16xf32>
    %cst_36 = arith.constant 0.000000e+00 : f32
    %69 = vector.broadcast %cst_36 : f32 to vector<2x16xf32>
    %70 = arith.maximumf %68, %69 : vector<2x16xf32>
    %c64_37 = arith.constant 64 : index
    %c112 = arith.constant 112 : index
    %71 = vector.load %arg2[%c64_37, %c112] : memref<104x128xf32, #tpu.memory_space<vmem>>, vector<16x16xf32>
    %cst_38 = arith.constant dense<0.000000e+00> : vector<2x16xf32>
    %72 = tpu.matmul %70, %71, %cst_38 {dimension_numbers = #tpu.dot_dimension_numbers<[1], [0], [0], [1], [0, 0, 1, 1], [], []>} : vector<2x16xf32>, vector<16x16xf32>, vector<2x16xf32> -> vector<2x16xf32>
    %c97_39 = arith.constant 97 : index
    %c112_40 = arith.constant 112 : index
    %73 = vector.load %arg2[%c97_39, %c112_40] : memref<104x128xf32, #tpu.memory_space<vmem>>, vector<1x16xf32>
    %74 = vector.broadcast %73 : vector<1x16xf32> to vector<2x16xf32>
    %75 = arith.addf %72, %74 : vector<2x16xf32>
    %cst_41 = arith.constant 0.000000e+00 : f32
    %76 = vector.broadcast %cst_41 : f32 to vector<2x16xf32>
    %77 = arith.maximumf %75, %76 : vector<2x16xf32>
    %c80 = arith.constant 80 : index
    %c112_42 = arith.constant 112 : index
    %78 = vector.load %arg2[%c80, %c112_42] : memref<104x128xf32, #tpu.memory_space<vmem>>, vector<16x4xf32>
    %cst_43 = arith.constant dense<0.000000e+00> : vector<2x4xf32>
    %79 = tpu.matmul %77, %78, %cst_43 {dimension_numbers = #tpu.dot_dimension_numbers<[1], [0], [0], [1], [0, 0, 1, 1], [], []>} : vector<2x16xf32>, vector<16x4xf32>, vector<2x4xf32> -> vector<2x4xf32>
    %c98 = arith.constant 98 : index
    %c0_44 = arith.constant 0 : index
    %80 = vector.load %arg2[%c98, %c0_44] : memref<104x128xf32, #tpu.memory_space<vmem>>, vector<1x4xf32>
    %81 = vector.broadcast %80 : vector<1x4xf32> to vector<2x4xf32>
    %82 = arith.addf %79, %81 : vector<2x4xf32>
    %cst_45 = arith.constant 0.000000e+00 : f32
    %83 = vector.broadcast %cst_45 : f32 to vector<2x128xf32>
    %c0_46 = arith.constant 0 : index
    %c0_47 = arith.constant 0 : index
    %84 = vector.load %arg3[%c0_46, %c0_47] : memref<2x128xf32, #tpu.memory_space<vmem>>, vector<2x128xf32>
    tpu.vector_store %arg3[%c0_46, %c0_47], %83 {strides = array<i32>} : memref<2x128xf32, #tpu.memory_space<vmem>>, vector<2x128xf32>,
    %c0_48 = arith.constant 0 : index
    %c0_49 = arith.constant 0 : index
    %85 = vector.load %arg3[%c0_48, %c0_49] : memref<2x128xf32, #tpu.memory_space<vmem>>, vector<2x4xf32>
    tpu.vector_store %arg3[%c0_48, %c0_49], %82 {strides = array<i32>} : memref<2x128xf32, #tpu.memory_space<vmem>>, vector<2x4xf32>,
    %c0_50 = arith.constant 0 : index
    %c4 = arith.constant 4 : index
    %86 = vector.load %arg3[%c0_50, %c4] : memref<2x128xf32, #tpu.memory_space<vmem>>, vector<2x32xf32>
    tpu.vector_store %arg3[%c0_50, %c4], %63 {strides = array<i32>} : memref<2x128xf32, #tpu.memory_space<vmem>>, vector<2x32xf32>,
    %c0_51 = arith.constant 0 : index
    %c36 = arith.constant 36 : index
    %87 = vector.load %arg3[%c0_51, %c36] : memref<2x128xf32, #tpu.memory_space<vmem>>, vector<2x32xf32>
    tpu.vector_store %arg3[%c0_51, %c36], %6 {strides = array<i32>} : memref<2x128xf32, #tpu.memory_space<vmem>>, vector<2x32xf32>,
    %c0_52 = arith.constant 0 : index
    %c68 = arith.constant 68 : index
    %88 = vector.load %arg3[%c0_52, %c68] : memref<2x128xf32, #tpu.memory_space<vmem>>, vector<2x32xf32>
    tpu.vector_store %arg3[%c0_52, %c68], %44 {strides = array<i32>} : memref<2x128xf32, #tpu.memory_space<vmem>>, vector<2x32xf32>,
    return
  }
}

</mosaic_0001>

<bundles_post_ra>
// kernel: tpu_custom_call.1
= control target key start
LH: loop header
LB: loop body
LE: loop exit
PB: predicated region body
PF: predicated region fallthrough
CT: control target
= control target key end

     0   :  { %8 = vsyncpa [#allocation3], 0  ;;  %s816_s0 = inlined_call_operand.hbm [shape: f32[2,64], index: 0, kind: input, shape index: {}]   ;;  %s817_s1 = inlined_call_operand.hbm [shape: f32[16,32], index: 1, kind: input, shape index: {}]   ;;  %s818_s2 = inlined_call_operand.hbm [shape: f32[104,128], index: 2, kind: input, shape index: {}]   ;;  %s819_s3 = inlined_call_operand.hbm [shape: f32[2,128], index: 3, kind: output, shape index: {}]  }
   0x1   :  { %9 = vsyncpa [#allocation6], 0  ;;  %s26_s14 = sshll.u32 %s817_s1, 4  ;;  %s27_s14 = int_to_ptr.hbm [resolvable:$true] %s26_s14 }
   0x2   :  { %10 = vsyncpa [#allocation4], 0  ;;  %s719_s15 = smov [#allocation5]   ;;  %s16_s19 = sshll.u32 %s816_s0, 4  ;;  %s17_s19 = int_to_ptr.hbm [resolvable:$true] %s16_s19 }
   0x3   :  { %s28_s16 = sshll.u32 %s719_s15, 4  ;;  %s720_s20 = smov 128   ;;  %s29_s16 = int_to_ptr.vmem [resolvable:$true] %s28_s16 }
   0x4   :  { %s721_s21 = smov 8   ;;  %s722_s22 = smov [#allocation2]  }
   0x5   :  { %34 = dma.hbm_to_vmem [thread:$0]  %s27_s14, 256, %s29_s16, [#allocation6], %s720_s20, %s720_s20, %s721_s21  }
   0x6   :  { %s18_s23 = sshll.u32 %s722_s22, 4  ;;  %s39_s26 = sshll.u32 %s818_s2, 4  ;;  %s19_s23 = int_to_ptr.vmem [resolvable:$true] %s18_s23  ;;  %s40_s26 = int_to_ptr.hbm [resolvable:$true] %s39_s26 }
   0x7   :  { %21 = dma.hbm_to_vmem [thread:$0]  %s17_s19, 32, %s19_s23, [#allocation3]  }
   0x8   :  { %s723_s1 = smov [#allocation7]  }
   0x9   :  { %s41_s27 = sshll.u32 %s723_s1, 4  ;;  %s42_s27 = int_to_ptr.vmem [resolvable:$true] %s41_s27 }
   0xa   :  { %47 = dma.hbm_to_vmem [thread:$0]  %s40_s26, 1664, %s42_s27, [#allocation6], %s720_s20, %s720_s20, %s721_s21  }
   0xb   :  { %713 = dma.done.wait [#allocation3], 32  }
   0xc   :  { %714 = vsyncadd [#allocation3], 4294967264 }
   0xd   :  { %715 = dma.done.wait [#allocation6], 1920  }
   0xe   :  { %716 = vsyncadd [#allocation6], 4294965376  ;;  %v762_v0 = vld [vmem:[#allocation7 + $0x58] sm:$0xff]  ;;  %v764_v1 = vld [vmem:[#allocation7 + $0x50] sm:$0xff]  ;;  %s724_s0 = smov 96   ;;  %vm105_vm0 = vcmask 261120   ;;  %v173_v18 = vlaneseq }
   0xf   :  { %124 = vmatpush.msra.mxu1 %v762_v0  ;;  %v98_v2 = vld [vmem:[#allocation7 + $0x48] sm:$0xff]  ;;  %v97_v3 = vld [vmem:[#allocation7 + $0x40] sm:$0xff]  ;;  %v61_v6 = vld [vmem:[#allocation5] sm:$0xff]  ;;  %vm138_vm1 = vcmask 1040384   ;;  %vm184_vm5 = vcmask 123904   ;;  %s725_s2 = smov 64   ;;  %v605_v57 = vpack.i.bf16 %v764_v1, %v762_v0 }
  0x10   :  { %v767_v4 = vpack.i.bf16 %v97_v3, %v98_v2  ;;  %v769_v5 = vld [vmem:[#allocation7 + $0x60] ss:$0 sm:$0xff]  ;;  %v62_v7 = vld [vmem:[#allocation5 + $0x8] sm:$0xff]  ;;  %v174_v19 = vshrl.u32 %v173_v18, 7  ;;  %v176_v21 = vand.u32 127, %v173_v18  ;;  %v69_v34 = vld [vmem:[#allocation7 + $0x30] sm:$0xff] }
  0x11   :  { %125 = vmatpush.msra.mxu1 %v764_v1  ;;  %102 = vrot.lane.b32.xlu0 %v769_v5, %s724_s0  ;;  %v70_v33 = vld [vmem:[#allocation7 + $0x38] sm:$0xff]  ;;  %v68_v35 = vld [vmem:[#allocation7 + $0x28] sm:$0xff]  ;;  %v67_v36 = vld [vmem:[#allocation7 + $0x20] sm:$0xff]  ;;  %vm73_vm6 = vcmask 523264   ;;  %s726_s28 = smov 32   ;;  %vm202_vm7 = vcmask 130048  }
  0x12   :  { %v179_v20 = vadd.s32 1, %v174_v19  ;;  %v177_v22 = vmul.u32 8, %v174_v19  ;;  %85 = vmatpush.msra.mxu0 %v70_v33  ;;  %v66_v37 = vld [vmem:[#allocation7 + $0x18] sm:$0xff]  ;;  %v65_v39 = vld [vmem:[#allocation7 + $0x10] sm:$0xff]  ;;  %v64_v40 = vld [vmem:[#allocation7 + $0x8] sm:$0xff]  ;;  %v575_v45 = vpack.i.bf16 %v67_v36, %v68_v35  ;;  %v570_v48 = vpack.i.bf16 %v69_v34, %v70_v33  ;;  %s727_s29 = smov 16  }
  0x13   :  { %126 = vmatpush.msra.mxu1 %v98_v2  ;;  %v550_v38 = vpack.i.bf16 %v66_v37, %v70_v33  ;;  %v63_v41 = vld [vmem:[#allocation7] sm:$0xff]  ;;  %v60_v42 = vld [vmem:[#allocation2] sm:$0x3]  ;;  %v555_v43 = vpack.i.bf16 %v65_v39, %v69_v34  ;;  %v560_v46 = vpack.i.bf16 %v64_v40, %v68_v35  ;;  %v580_v51 = vpack.i.bf16 %v65_v39, %v66_v37  ;;  %s728_s30 = smov 36   ;;  %s729_s4 = smov 68  }
  0x14   :  { %v180_v23 = vmul.u32 8, %v179_v20  ;;  %vm178_vm2 = vcmp.ge.s32.totalorder %v176_v21, %v177_v22  ;;  %86 = vmatpush.msra.mxu0 %v69_v34  ;;  %v565_v44 = vpack.i.bf16 %v63_v41, %v67_v36  ;;  %v585_v47 = vpack.i.bf16 %v63_v41, %v64_v40  ;;  %v790_v50 = vld [vmem:[#allocation7 + $0x61] ss:$0 sm:$0xff]  ;;  %s730_s5 = smov 4   ;;  %s732_s6 = smov [#allocation8]  }
  0x15   :  { %127 = vmatpush.msra.mxu1 %v97_v3  ;;  %vm481_vm8 = vcmask 25600   ;;  %vm486_vm9 = vcmask 287776   ;;  %s505_s7 = sshll.u32 %s732_s6, 4  ;;  %s507_s10 = sshll.u32 %s819_s3, 4  ;;  %vm492_vm10 = vcmask 550176   ;;  %vm498_vm11 = vcmask 812576   ;;  %s506_s7 = int_to_ptr.vmem [resolvable:$true] %s505_s7  ;;  %s508_s10 = int_to_ptr.hbm [resolvable:$true] %s507_s10 }
  0x16   :  { %519 = vmatmul.msk.f32.vlgmr.msra.gmra.mxu1 %vm105_vm0, %v61_v6  ;;  %vm181_vm3 = vcmp.lt.s32.totalorder %v176_v21, %v180_v23  ;;  %87 = vmatpush.msra.mxu0 %v68_v35 }
  0x17   :  { %vm182_vm4 = vmand %vm178_vm2, %vm181_vm3 }
  0x18   :  { %88 = vmatpush.msra.mxu0 %v67_v36 }
  0x1a   :  { %89 = vmatpush.msra.mxu0 %v66_v37 }
  0x1c   :  { %90 = vmatpush.msra.mxu0 %v65_v39 }
  0x1e   :  { %520 = vmatmul.msk.f32.gmra.mxu1 %vm105_vm0, %v62_v7  ;;  %91 = vmatpush.msra.mxu0 %v64_v40 }
  0x20   :  { %92 = vmatpush.msra.mxu0 %v63_v41 }
  0x21   :  { %518 = vmatmul.msk.f32.vlgmr.msra.gmra.mxu0 %vm73_vm6, %v60_v42 }
  0x83   :  { %v103_v8 = vpop.permute.xlu0 %102 }
  0x93   :  { %v129_v9 = vpop.f32.mrf.mxu1 }
  0x94   :  { %v130_v10 = vadd.f32 %v129_v9, %v103_v8 }
  0x96   :  { %141 = vrot.lane.b32.xlu1 %v130_v10, %s724_s0 }
  0x9b   :  { %v132_v11 = vpop.f32.mrf.mxu1 }
  0x9c   :  { %v133_v12 = vadd.f32 %v132_v11, %v103_v8 }
  0x9e   :  { %v136_v13 = vrot.slane %v133_v12, 7  ;;  %143 = vrot.lane.b32.xlu0 %v133_v12, %s724_s0  ;;  %v545_v14 = vpack.i.bf16 %v130_v10, %v133_v12  ;;  %v94_v7 = vpop.f32.mrf.mxu0 }
  0x9f   :  { %v95_v8 = vadd.f32 %v769_v5, %v94_v7 }
  0xa0   :  { %v139_v15 = vsel %vm138_vm1, %v130_v10, %v136_v13 }
  0xa1   :  { %v230_v9 = vmax.f32 %v95_v8, 0.0 }
  0xa6   :  { %551 = vrot.lane.b32.xlu0 %v550_v38, %s724_s0 }
  0xae   :  { %556 = vrot.lane.b32.xlu0 %v555_v43, %s724_s0 }
  0xb6   :  { %561 = vrot.lane.b32.xlu0 %v560_v46, %s724_s0 }
  0xbe   :  { %571 = vrot.lane.b32.xlu0 %v570_v48, %s726_s28 }
  0xc6   :  { %581 = vrot.lane.b32.xlu0 %v580_v51, %s726_s28  ;;  %v731_v51 = vmov 0.0  }
  0xc7   :  { %480 = vst [vmem:[#allocation8] sm:$0x3] %v731_v51 }
  0xce   :  { %596 = vrot.lane.b32.xlu0 %v767_v4, %s726_s28 }
  0xd6   :  { %385 = vrot.lane.b32.xlu0 %v790_v50, %s726_s28 }
  0xde   :  { %422 = vrot.lane.b32.xlu0 %v790_v50, %s727_s29 }
  0xe6   :  { %489 = vrot.lane.b32.xlu0 %v95_v8, %s728_s30 }
 0x108   :  { %v142_v17 = vpop.permute.xlu1 %141 }
 0x110   :  { %v144_v16 = vpop.permute.xlu0 %143 }
 0x111   :  { %521 = vmatpush.xpose.msk.msra.mxu2 %vm105_vm0, %v144_v16 }
 0x115   :  { %522 = vmatpush.xpose.msk.msra.mxu2 %vm105_vm0, %v142_v17 }
 0x118   :  { %523 = vmatmul.msk.f32.vlgmr.msra.gmra.mxu2 %vm105_vm0, %v139_v15  ;;  %v552_v58 = vpop.permute.xlu0 %551 }
 0x119   :  { %v553_v59 = vunpack.i.l.bf16 %v552_v58  ;;  %v554_v60 = vunpack.i.h.bf16 %v552_v58 }
 0x11b   :  { %302 = vmatpush.msrb.mxu2 %v554_v60 }
 0x120   :  { %v557_v61 = vpop.permute.xlu0 %556 }
 0x121   :  { %v558_v62 = vunpack.i.l.bf16 %v557_v61  ;;  %v559_v63 = vunpack.i.h.bf16 %v557_v61 }
 0x123   :  { %303 = vmatpush.msrb.mxu2 %v559_v63 }
 0x128   :  { %v562_v2 = vpop.permute.xlu0 %561 }
 0x129   :  { %v564_v6 = vunpack.i.h.bf16 %v562_v2 }
 0x12b   :  { %304 = vmatpush.msrb.mxu2 %v564_v6 }
 0x130   :  { %v572_v18 = vpop.permute.xlu0 %571 }
 0x131   :  { %v573_v19 = vunpack.i.l.bf16 %v572_v18  ;;  %v574_v20 = vunpack.i.h.bf16 %v572_v18 }
 0x133   :  { %357 = vmatpush.msrb.mxu1 %v573_v19 }
 0x135   :  { %358 = vmatpush.msrb.mxu1 %v574_v20 }
 0x138   :  { %v582_v23 = vpop.permute.xlu0 %581 }
 0x140   :  { %v597_v36 = vpop.permute.xlu0 %596 }
 0x141   :  { %v598_v37 = vunpack.i.l.bf16 %v597_v36  ;;  %v599_v38 = vunpack.i.h.bf16 %v597_v36 }
 0x148   :  { %v386_v43 = vpop.permute.xlu0 %385 }
 0x19b   :  { %v169_v24 = vpop.f32.mrf.mxu2 }
 0x19c   :  { %v172_v25 = vmul.f32 0.17677669, %v169_v24  ;;  %v583_v24 = vunpack.i.l.bf16 %v582_v23 }
 0x19e   :  { %v183_v26 = vsel %vm182_vm4, %v172_v25, -1e+30  ;;  %v584_v25 = vunpack.i.h.bf16 %v582_v23 }
 0x19f   :  { %v185_v27 = vsel %vm184_vm5, %v183_v26, -inf }
 0x1a0   :  { %186 = vmax.xlane.f32.xlu1 %v185_v27 }
 0x1b9   :  { %591 = vrot.lane.b32.xlu1 %v605_v57, %s726_s28 }
 0x213   :  { %v187_v28 = vpop.xlane.xlu1 %186 }
 0x214   :  { %v188_v29 = vsub.f32 %v183_v26, %v187_v28 }
 0x216   :  { %v189_v30 = vmul.f32 1.442695, %v188_v29 }
 0x218   :  { %613 = vpow2.f32 %v189_v30 }
 0x21e   :  { %v614_v31 = vpop.eup %613 }
 0x21f   :  { %v191_v32 = vsel %vm184_vm5, %v614_v31, 0.0 }
 0x220   :  { %192 = vadd.xlane.f32.xlu2 %v191_v32 }
 0x22b   :  { %v592_v33 = vpop.permute.xlu1 %591 }
 0x22c   :  { %v594_v34 = vunpack.i.h.bf16 %v592_v33  ;;  %v593_v35 = vunpack.i.l.bf16 %v592_v33 }
 0x238   :  { %546 = vrot.lane.b32.xlu2 %v545_v14, %s725_s2 }
 0x240   :  { %566 = vrot.lane.b32.xlu2 %v565_v44, %s724_s0 }
 0x248   :  { %576 = vrot.lane.b32.xlu2 %v575_v45, %s726_s28 }
 0x250   :  { %586 = vrot.lane.b32.xlu2 %v585_v47, %s726_s28  ;;  %v423_v47 = vpop.permute.xlu0 %422 }
 0x258   :  { %343 = vrot.lane.b32.xlu2 %v790_v50, %s725_s2 }
 0x260   :  { %601 = vrot.lane.b32.xlu2 %v767_v4, %s727_s29  ;;  %v563_v4 = vunpack.i.l.bf16 %v562_v2 }
 0x268   :  { %606 = vrot.lane.b32.xlu2 %v605_v57, %s727_s29 }
 0x293   :  { %v193_v49 = vpop.xlane.xlu2 %192 }
 0x294   :  { %615 = vrcp.f32 %v193_v49 }
 0x29a   :  { %v616_v53 = vpop.eup %615 }
 0x29b   :  { %v547_v52 = vpop.permute.xlu2 %546  ;;  %v195_v56 = vmul.f32 %v616_v53, %v614_v31 }
 0x29c   :  { %v548_v54 = vunpack.i.l.bf16 %v547_v52  ;;  %v549_v55 = vunpack.i.h.bf16 %v547_v52  ;;  %v612_v52 = vld [vmem:[#allocation7 + $0x62] ss:$0 sm:$0xff] }
 0x29e   :  { %220 = vmatpush.msra.mxu3 %v548_v54 }
 0x2a0   :  { %221 = vmatpush.msra.mxu3 %v549_v55 }
 0x2a1   :  { %524 = vmatmul.msk.f32.vlgmr.msra.gmra.mxu3 %vm202_vm7, %v195_v56  ;;  %v490_v56 = vpop.permute.xlu0 %489 }
 0x2a2   :  { %263 = vmatpush.msrb.mxu3 %v553_v59 }
 0x2a3   :  { %v567_v3 = vpop.permute.xlu2 %566 }
 0x2a4   :  { %264 = vmatpush.msrb.mxu3 %v558_v62  ;;  %v568_v0 = vunpack.i.l.bf16 %v567_v3  ;;  %v569_v1 = vunpack.i.h.bf16 %v567_v3 }
 0x2a6   :  { %265 = vmatpush.msrb.mxu3 %v563_v4  ;;  %305 = vmatpush.msrb.mxu2 %v569_v1 }
 0x2a7   :  { %526 = vmatmul.msk.f32.vlgmr.msrb.gmra.mxu2 %vm105_vm0, %v230_v9 }
 0x2a8   :  { %266 = vmatpush.msrb.mxu3 %v568_v0 }
 0x2aa   :  { %403 = vmatpush.msra.mxu3 %v593_v35 }
 0x2ab   :  { %v577_v10 = vpop.permute.xlu2 %576 }
 0x2ac   :  { %v578_v21 = vunpack.i.l.bf16 %v577_v10  ;;  %v579_v22 = vunpack.i.h.bf16 %v577_v10  ;;  %404 = vmatpush.msra.mxu3 %v594_v34 }
 0x2ae   :  { %359 = vmatpush.msrb.mxu1 %v578_v21  ;;  %405 = vmatpush.msra.mxu3 %v598_v37 }
 0x2b0   :  { %360 = vmatpush.msrb.mxu1 %v579_v22  ;;  %406 = vmatpush.msra.mxu3 %v599_v38 }
 0x2b2   :  { %361 = vmatpush.msrb.mxu1 %v583_v24 }
 0x2b3   :  { %v587_v11 = vpop.permute.xlu2 %586 }
 0x2b4   :  { %362 = vmatpush.msrb.mxu1 %v584_v25  ;;  %v588_v26 = vunpack.i.l.bf16 %v587_v11  ;;  %v589_v27 = vunpack.i.h.bf16 %v587_v11 }
 0x2b6   :  { %363 = vmatpush.msrb.mxu1 %v588_v26 }
 0x2b8   :  { %364 = vmatpush.msrb.mxu1 %v589_v27 }
 0x2bb   :  { %v344_v12 = vpop.permute.xlu2 %343 }
 0x2c3   :  { %v602_v5 = vpop.permute.xlu2 %601 }
 0x2c4   :  { %v603_v41 = vunpack.i.l.bf16 %v602_v5  ;;  %v604_v42 = vunpack.i.h.bf16 %v602_v5 }
 0x2c6   :  { %442 = vmatpush.msrb.mxu0 %v603_v41 }
 0x2c8   :  { %443 = vmatpush.msrb.mxu0 %v604_v42 }
 0x2cb   :  { %v607_v15 = vpop.permute.xlu2 %606 }
 0x2cc   :  { %v609_v16 = vunpack.i.h.bf16 %v607_v15  ;;  %v608_v17 = vunpack.i.l.bf16 %v607_v15 }
 0x2ce   :  { %474 = vmatpush.msra.mxu2 %v608_v17 }
 0x2d0   :  { %475 = vmatpush.msra.mxu2 %v609_v16 }
 0x324   :  { %v223_v13 = vpop.f32.mrf.mxu3 }
 0x325   :  { %v231_v14 = vmax.f32 %v223_v13, 0.0  ;;  %495 = vrot.lane.b32.xlu2 %v223_v13, %s729_s4 }
 0x327   :  { %525 = vmatmul.msk.f32.vlgmr.msrb.gmra.mxu3 %vm105_vm0, %v231_v14 }
 0x32a   :  { %v307_v28 = vpop.f32.mrf.mxu2 }
 0x37f   :  { %v496_v57 = vpop.permute.xlu2 %495 }
 0x3aa   :  { %v268_v29 = vpop.f32.mrf.mxu3 }
 0x3ab   :  { %v308_v30 = vadd.f32 %v307_v28, %v268_v29 }
 0x3ad   :  { %v312_v31 = vadd.f32 %v790_v50, %v308_v30 }
 0x3af   :  { %v313_v32 = vmax.f32 %v312_v31, 0.0 }
 0x3b1   :  { %527 = vmatmul.msk.f32.vlgmr.msrb.gmra.mxu1 %vm73_vm6, %v313_v32 }
 0x42e   :  { %v366_v39 = vpop.f32.mrf.mxu1 }
 0x42f   :  { %v367_v40 = vadd.f32 %v366_v39, %v344_v12 }
 0x431   :  { %483 = vrot.lane.b32.xlu1 %v367_v40, %s730_s5  ;;  %528 = vmatmul.msk.f32.vlgmr.msra.gmra.mxu3 %vm105_vm0, %v367_v40 }
 0x4a3   :  { %v484_v55 = vpop.permute.xlu1 %483 }
 0x4b4   :  { %v408_v44 = vpop.f32.mrf.mxu3 }
 0x4b5   :  { %v409_v45 = vadd.f32 %v408_v44, %v386_v43 }
 0x4b7   :  { %v411_v46 = vmax.f32 %v409_v45, 0.0 }
 0x4b9   :  { %529 = vmatmul.msk.f32.vlgmr.msrb.gmra.mxu0 %vm202_vm7, %v411_v46 }
 0x536   :  { %v445_v48 = vpop.f32.mrf.mxu0 }
 0x537   :  { %v446_v49 = vadd.f32 %v445_v48, %v423_v47 }
 0x539   :  { %v448_v50 = vmax.f32 %v446_v49, 0.0 }
 0x53b   :  { %530 = vmatmul.msk.f32.vlgmr.msra.gmra.mxu2 %vm202_vm7, %v448_v50 }
 0x5be   :  { %v477_v53 = vpop.f32.mrf.mxu2 }
 0x5bf   :  { %v478_v54 = vadd.f32 %v612_v52, %v477_v53 }
 0x5c1   :  { %482 = vst.msk [vmem:[#allocation8] sm:$0x3] %vm481_vm8, %v478_v54 }
 0x5c2   :  { %487 = vst.msk [vmem:[#allocation8] sm:$0x3] %vm486_vm9, %v484_v55 }
 0x5c3   :  { %493 = vst.msk [vmem:[#allocation8] sm:$0x3] %vm492_vm10, %v490_v56 }
 0x5c4   :  { %499 = vst.msk [vmem:[#allocation8] sm:$0x3] %vm498_vm11, %v496_v57 }
 0x5c5   :  { %510 = dma.vmem_to_hbm [thread:$0]  %s506_s7, 32, %s508_s10, [#allocation4]  }
 0x5c6   :  { %717 = dma.done.wait [#allocation4], 32  }
 0x5c7   :  { %718 = vsyncadd [#allocation4], 4294967264 }
 0x5c8   :  { %515 = vsyncpa [#allocation3], 1 }
 0x5c9   :  { %516 = vsyncpa [#allocation6], 1 }
 0x5ca   :  { %517 = vsyncpa [#allocation4], 1 }

</bundles_post_ra>
